<compile_context>
chip_gen: v5e
topology: v5e:2x2
jax: 0.10.0
libtpu: 0.0.40
codegen_flags: <defaults>
</compile_context>

<pallas_src>
import functools

import jax
import jax.numpy as jnp
from jax import lax
from jax.experimental import pallas as pl
from jax.experimental.pallas import tpu as pltpu

_EPS = 1e-5
_MIB = 1024 * 1024


# ---------------------------------------------------------------------------
# Hardware-aware configuration
# ---------------------------------------------------------------------------
def _vmem_capacity_bytes() -> int:
    try:
        info = pltpu.get_tpu_info()
        for attr in ("vmem_capacity_bytes", "vmem_bytes", "vmem_size_bytes"):
            v = getattr(info, attr, None)
            if v:
                return int(v)
    except Exception:
        pass
    return 128 * _MIB


def _hw_config():
    vmem = _vmem_capacity_bytes()
    if vmem >= 96 * _MIB:
        # v5e / v6e: 128 MiB VMEM, one TensorCore per chip.
        return dict(fused_bytes=24 * _MIB, fused_tile=4 * _MIB,
                    pass_tile=8 * _MIB, vmem_limit=64 * _MIB)
    # v7x: 64 MiB VMEM per TC, 2 TCs -> keep the (single-core, sequential)
    # fused path small and cap tiles / scoped VMEM so pass 2's double-buffered
    # footprint (in + out, 2 buffers each, + f32 temporaries) fits.
    return dict(fused_bytes=12 * _MIB, fused_tile=4 * _MIB,
                pass_tile=6 * _MIB, vmem_limit=44 * _MIB)


def _sublane_granule(itemsize: int) -> int:
    # f32 -> 8 rows, bf16 -> 16, int8/fp8 -> 32 (packed sublane granularity).
    return max(8, 32 // max(1, itemsize))


def _choose_view(total: int):
    """Pick (rows, lanes) with rows*lanes == total (no pad/slice copies).

    Prefers lanes that are a multiple of 128 (unmasked vregs), then best lane
    utilisation, then wider lanes; requires rows >= 8 when possible.
    """
    if total < 128:
        return 1, total
    best = None
    for lanes in range(128, min(total, 4096) + 1):
        if total % lanes:
            continue
        rows = total // lanes
        util = lanes / ((-(-lanes // 128)) * 128)
        score = (1 if rows >= 8 else 0, 1 if lanes % 128 == 0 else 0, util, lanes)
        if best is None or score > best[0]:
            best = (score, rows, lanes)
    if best is not None:
        return best[1], best[2]
    # Pathological totals (e.g. large primes): correct but lane-sparse view.
    # TODO(synk): near-square factorisation / tail split for prime totals.
    if total <= 65536:
        return 1, total
    return total, 1


def _pick_row_tile(rows, lanes, itemsize, target_bytes, granule, requested=None):
    if rows <= granule:
        return rows
    if requested is not None:
        rt = max(granule, (int(requested) // granule) * granule)
    else:
        rt = max(granule, (target_bytes // (lanes * itemsize)) // granule * granule)
    return max(granule, min(rt, (rows // granule) * granule))


# ---------------------------------------------------------------------------
# Fused path: single pallas_call, (2, n_tiles) phase grid, 2N HBM bytes,
# DMA/compute overlap via BlockSpec pipelining + persistent VMEM stash.
# ---------------------------------------------------------------------------
def _fused_kernel(x_ref, o_ref, xcopy_ref, n_ref, mean_ref, m2_ref, inv_ref, *,
                  n_tiles, row_tile, rows_total, lanes, ragged):
    phase = pl.program_id(0)
    i = pl.program_id(1)

    def merge(n_b, s_b, m2_b):
        # Chan's parallel-variance merge of the running (n, mean, M2) scratch
        # (each a (1,1) f32 VMEM ref) with the current tile's stats.
        mean_b = s_b / n_b
        n_a = n_ref[...]
        mean_a = mean_ref[...]
        n_ab = n_a + n_b
        delta = mean_b - mean_a
        n_ref[...] = n_ab
        mean_ref[...] = mean_a + delta * (n_b / n_ab)
        m2_ref[...] = m2_ref[...] + m2_b + delta * delta * (n_a * (n_b / n_ab))

    @pl.when(phase == 0)
    def _phase0():
        @pl.when(i == 0)
        def _():
            n_ref[...] = jnp.zeros_like(n_ref)
            mean_ref[...] = jnp.zeros_like(mean_ref)
            m2_ref[...] = jnp.zeros_like(m2_ref)

        xb = x_ref[...]
        xcopy_ref[i] = xb                       # stash for phase 1 (orig dtype)
        xf = xb.astype(jnp.float32)

        if not ragged:
            n_b = jnp.float32(row_tile * lanes)
            s_b = jnp.sum(xf)
            c = xf - s_b / n_b
            merge(n_b, s_b, jnp.sum(c * c))
        else:
            # Masking only on the ragged boundary tile; interior tiles stay at
            # the HBM roofline (no per-element iota/compare/select work).
            @pl.when(i < n_tiles - 1)
            def _():
                n_b = jnp.float32(row_tile * lanes)
                s_b = jnp.sum(xf)
                c = xf - s_b / n_b
                merge(n_b, s_b, jnp.sum(c * c))

            @pl.when(i == n_tiles - 1)
            def _():
                vrows = rows_total - i * row_tile
                valid = lax.broadcasted_iota(jnp.int32, xf.shape, 0) < vrows
                n_b = vrows.astype(jnp.float32) * lanes
                s_b = jnp.sum(jnp.where(valid, xf, 0.0))
                c = jnp.where(valid, xf - s_b / n_b, 0.0)
                merge(n_b, s_b, jnp.sum(c * c))

    @pl.when(phase == 1)
    def _phase1():
        @pl.when(i == 0)
        def _():
            var = m2_ref[...] / (n_ref[...] - 1.0)   # NaN for n==1 (torch.std)
            inv_ref[...] = 1.0 / (jnp.sqrt(var) + _EPS)

        xf = xcopy_ref[i].astype(jnp.float32)
        o_ref[...] = ((xf - mean_ref[...]) * inv_ref[...]).astype(o_ref.dtype)


def _fused_call(x2d, dtype, rows, lanes, rt, cfg):
    n_tiles = -(-rows // rt)
    ragged = rows % rt != 0

    # Phase 0 streams tile i; phase 1 keeps pointing at the last tile so the
    # pipeline issues no further input DMAs (same block index => no re-fetch).
    x_map = lambda p, i: ((1 - p) * i + p * (n_tiles - 1), 0)
    # Phase 0 parks the output on tile 0 (never flushed while the index is
    # unchanged); phase 1 walks the tiles, flushing each once it is final.
    o_map = lambda p, i: (p * i, 0)

    kernel = functools.partial(
        _fused_kernel, n_tiles=n_tiles, row_tile=rt,
        rows_total=rows, lanes=lanes, ragged=ragged)

    return pl.pallas_call(
        kernel,
        out_shape=jax.ShapeDtypeStruct((rows, lanes), dtype),
        grid_spec=pltpu.PrefetchScalarGridSpec(
            num_scalar_prefetch=0,
            grid=(2, n_tiles),
            in_specs=[pl.BlockSpec((rt, lanes), x_map)],
            out_specs=pl.BlockSpec((rt, lanes), o_map),
            scratch_shapes=[
                pltpu.VMEM((n_tiles, rt, lanes), dtype),   # stashed input
                pltpu.VMEM((1, 1), jnp.float32),           # running n
                pltpu.VMEM((1, 1), jnp.float32),           # running mean
                pltpu.VMEM((1, 1), jnp.float32),           # running M2
                pltpu.VMEM((1, 1), jnp.float32),           # 1/(std+eps)
            ]),
        compiler_params=pltpu.CompilerParams(
            dimension_semantics=("arbitrary", "arbitrary"),
            vmem_limit_bytes=cfg["vmem_limit"]),
    )(x2d)


# ---------------------------------------------------------------------------
# Two-pass path (large inputs): parallel partial-stats pass + parallel
# normalization pass, Chan merge in tiny JAX glue in between.
# ---------------------------------------------------------------------------
def _partials_kernel(x_ref, out_ref, *, rows_total, row_tile, last_block, ragged):
    i = pl.program_id(0)
    lanes = x_ref.shape[-1]

    def emit(n_b, valid):
        xf = x_ref[...].astype(jnp.float32)
        xs = jnp.where(valid, xf, 0.0) if valid is not None else xf
        s_b = jnp.sum(xs)
        c = xf - s_b / n_b
        if valid is not None:
            c = jnp.where(valid, c, 0.0)
        m2_b = jnp.sum(c * c)
        col = lax.broadcasted_iota(jnp.int32, (8, 128), 1)
        tile = jnp.where(col == 0, n_b,
               jnp.where(col == 1, s_b,
               jnp.where(col == 2, m2_b, jnp.float32(0.0))))
        out_ref[...] = tile[None]                          # (1, 8, 128)

    if not ragged:
        emit(jnp.float32(row_tile * lanes), None)
    else:
        @pl.when(i < last_block)
        def _():
            emit(jnp.float32(row_tile * lanes), None)

        @pl.when(i == last_block)
        def _():
            vrows = rows_total - i * row_tile
            valid = lax.broadcasted_iota(jnp.int32, (row_tile, lanes), 0) < vrows
            emit(vrows.astype(jnp.float32) * lanes, valid)


def _normalize_kernel(stats_ref, x_ref, o_ref):
    mean = stats_ref[0]
    inv = stats_ref[1]
    o_ref[...] = ((x_ref[...].astype(jnp.float32) - mean) * inv).astype(o_ref.dtype)


def _two_pass(x2d, dtype, rows, lanes, rt, cfg):
    grid_len = -(-rows // rt)
    ragged = rows % rt != 0

    partials = pl.pallas_call(
        functools.partial(_partials_kernel, rows_total=rows, row_tile=rt,
                          last_block=grid_len - 1, ragged=ragged),
        out_shape=jax.ShapeDtypeStruct((grid_len, 8, 128), jnp.float32),
        grid_spec=pltpu.PrefetchScalarGridSpec(
            num_scalar_prefetch=0,
            grid=(grid_len,),
            in_specs=[pl.BlockSpec((rt, lanes), lambda i: (i, 0))],
            out_specs=pl.BlockSpec((1, 8, 128), lambda i: (i, 0, 0))),
        compiler_params=pltpu.CompilerParams(
            dimension_semantics=("parallel",),
            vmem_limit_bytes=cfg["vmem_limit"]),
    )(x2d)

    # Chan's parallel-variance merge of per-block partials (tiny, stays in XLA).
    n_b = partials[:, 0, 0]
    s_b = partials[:, 0, 1]
    m2_b = partials[:, 0, 2]
    n = jnp.sum(n_b)
    mean = jnp.sum(s_b) / n
    mean_b = s_b / n_b
    m2 = jnp.sum(m2_b) + jnp.sum(n_b * jnp.square(mean_b - mean))
    var = m2 / (n - 1.0)                     # NaN for n==1, matching torch.std
    inv = 1.0 / (jnp.sqrt(var) + _EPS)
    stats = jnp.stack([mean, inv]).astype(jnp.float32)     # (2,) -> SMEM

    return pl.pallas_call(
        _normalize_kernel,
        out_shape=jax.ShapeDtypeStruct((rows, lanes), dtype),
        grid_spec=pltpu.PrefetchScalarGridSpec(
            num_scalar_prefetch=0,
            grid=(grid_len,),
            in_specs=[
                pl.BlockSpec(memory_space=pltpu.MemorySpace.SMEM),   # stats
                pl.BlockSpec((rt, lanes), lambda i: (i, 0)),
            ],
            out_specs=pl.BlockSpec((rt, lanes), lambda i: (i, 0))),
        compiler_params=pltpu.CompilerParams(
            dimension_semantics=("parallel",),
            vmem_limit_bytes=cfg["vmem_limit"]),
    )(stats, x2d)


# ---------------------------------------------------------------------------
# Public wrapper (forward of SpectrogramAdapter; target_size is unused).
# ---------------------------------------------------------------------------
def spectrogram_adapter(x: jax.Array, *,
                        max_fused_bytes: int | None = None,
                        row_tile: int | None = None) -> jax.Array:
    orig_shape = x.shape
    dtype = x.dtype
    total = int(x.size)
    if total == 0:
        return x
    itemsize = jnp.dtype(dtype).itemsize
    cfg = _hw_config()
    fused_limit = cfg["fused_bytes"] if max_fused_bytes is None else int(max_fused_bytes)

    rows, lanes = _choose_view(total)
    x2d = x.reshape(rows, lanes)             # free bitcast reshape (row-major)
    granule = _sublane_granule(itemsize)

    if total * itemsize <= fused_limit:
        rt = _pick_row_tile(rows, lanes, itemsize, cfg["fused_tile"], granule, row_tile)
        out2d = _fused_call(x2d, dtype, rows, lanes, rt, cfg)
    else:
        rt = _pick_row_tile(rows, lanes, itemsize, cfg["pass_tile"], granule, row_tile)
        out2d = _two_pass(x2d, dtype, rows, lanes, rt, cfg)
    return out2d.reshape(orig_shape)


def _reference(x):
    return (x - jnp.mean(x)) / (jnp.std(x, ddof=1) + _EPS)


if __name__ == "__main__":
    key = jax.random.PRNGKey(0)
    k1, k2, k3, k4 = jax.random.split(key, 4)

    # 1) Small input -> fused path, single tile.
    x1 = jax.random.normal(k1, (2, 4, 16, 16), dtype=jnp.float32) * 3.0 + 1.5
    out1 = jax.block_until_ready(spectrogram_adapter(x1))
    assert out1.shape == x1.shape and out1.dtype == x1.dtype
    assert jnp.allclose(out1, _reference(x1), atol=1e-4, rtol=1e-4), "fused path mismatch"

    # 2) Fused pipelined path with several tiles and a ragged boundary tile.
    x2 = jax.random.normal(k2, (4, 4, 36, 128), dtype=jnp.float32) * 2.0 - 0.5
    out2 = jax.block_until_ready(spectrogram_adapter(x2, row_tile=8))
    assert jnp.allclose(out2, _reference(x2), atol=1e-4, rtol=1e-4), "fused multi-tile mismatch"

    # 3) Force the two-pass tiled path (parallel grids, no masking).
    x3 = jax.random.normal(k3, (4, 8, 64, 128), dtype=jnp.float32) + 0.25
    out3 = jax.block_until_ready(
        spectrogram_adapter(x3, max_fused_bytes=0, row_tile=16))
    assert jnp.allclose(out3, _reference(x3), atol=1e-4, rtol=1e-4), "two-pass mismatch"

    # 4) Two-pass path on a ragged, non-128-divisible shape (boundary masking,
    #    no wrapper-level pad/slice copies).
    x4 = jax.random.normal(k4, (3, 5, 50, 60), dtype=jnp.float32) + 10.0
    out4 = jax.block_until_ready(
        spectrogram_adapter(x4, max_fused_bytes=0, row_tile=8))
    assert out4.shape == x4.shape
    assert jnp.allclose(out4, _reference(x4), atol=1e-4, rtol=1e-4), "masked boundary mismatch"

    print("KERNEL_OK")
</pallas_src>

<mosaic_0001>
module attributes {stable_mosaic.version = 11 : i64} {
  func.func @_fused_kernel(%arg0: i32, %arg1: i32, %arg2: memref<8x256xf32, #tpu.memory_space<vmem>>, %arg3: memref<8x256xf32, #tpu.memory_space<vmem>>, %arg4: memref<1x8x256xf32, #tpu.memory_space<vmem>>, %arg5: memref<1x1xf32, #tpu.memory_space<vmem>>, %arg6: memref<1x1xf32, #tpu.memory_space<vmem>>, %arg7: memref<1x1xf32, #tpu.memory_space<vmem>>, %arg8: memref<1x1xf32, #tpu.memory_space<vmem>>) attributes {dimension_semantics = [#tpu.dimension_semantics<arbitrary>, #tpu.dimension_semantics<arbitrary>], iteration_bounds = array<i64: 2, 1>, scalar_prefetch = 0 : i64, scratch_operands = 5 : i64, tpu.core_type = #tpu.core_type<tc>, window_params = [{transform_indices = @transform_0, window_bounds = array<i64: 8, 256>}, {transform_indices = @transform_1, window_bounds = array<i64: 8, 256>}]} {
    %c0_i32 = arith.constant 0 : i32
    %0 = arith.cmpi eq, %arg0, %c0_i32 : i32
    %1 = arith.extui %0 : i1 to i32
    %c0_i32_0 = arith.constant 0 : i32
    %2 = arith.cmpi ne, %1, %c0_i32_0 : i32
    scf.if %2 {
      %c0_i32_2 = arith.constant 0 : i32
      %6 = arith.cmpi eq, %arg1, %c0_i32_2 : i32
      %7 = arith.extui %6 : i1 to i32
      %c0_i32_3 = arith.constant 0 : i32
      %8 = arith.cmpi ne, %7, %c0_i32_3 : i32
      scf.if %8 {
        %cst_25 = arith.constant 0.000000e+00 : f32
        %49 = vector.broadcast %cst_25 : f32 to vector<1x1xf32>
        %c0_26 = arith.constant 0 : index
        %c0_27 = arith.constant 0 : index
        %50 = vector.load %arg5[%c0_26, %c0_27] : memref<1x1xf32, #tpu.memory_space<vmem>>, vector<1x1xf32>
        tpu.vector_store %arg5[%c0_26, %c0_27], %49 {strides = array<i32>} : memref<1x1xf32, #tpu.memory_space<vmem>>, vector<1x1xf32>,
        %cst_28 = arith.constant 0.000000e+00 : f32
        %51 = vector.broadcast %cst_28 : f32 to vector<1x1xf32>
        %c0_29 = arith.constant 0 : index
        %c0_30 = arith.constant 0 : index
        %52 = vector.load %arg6[%c0_29, %c0_30] : memref<1x1xf32, #tpu.memory_space<vmem>>, vector<1x1xf32>
        tpu.vector_store %arg6[%c0_29, %c0_30], %51 {strides = array<i32>} : memref<1x1xf32, #tpu.memory_space<vmem>>, vector<1x1xf32>,
        %cst_31 = arith.constant 0.000000e+00 : f32
        %53 = vector.broadcast %cst_31 : f32 to vector<1x1xf32>
        %c0_32 = arith.constant 0 : index
        %c0_33 = arith.constant 0 : index
        %54 = vector.load %arg7[%c0_32, %c0_33] : memref<1x1xf32, #tpu.memory_space<vmem>>, vector<1x1xf32>
        tpu.vector_store %arg7[%c0_32, %c0_33], %53 {strides = array<i32>} : memref<1x1xf32, #tpu.memory_space<vmem>>, vector<1x1xf32>,
      } else {
      }
      %c0 = arith.constant 0 : index
      %c0_4 = arith.constant 0 : index
      %9 = vector.load %arg2[%c0, %c0_4] : memref<8x256xf32, #tpu.memory_space<vmem>>, vector<8x256xf32>
      %10 = arith.index_cast %arg1 : i32 to index
      %c0_5 = arith.constant 0 : index
      %c0_6 = arith.constant 0 : index
      %11 = vector.load %arg4[%10, %c0_5, %c0_6] : memref<1x8x256xf32, #tpu.memory_space<vmem>>, vector<1x8x256xf32>
      %12 = vector.shape_cast %11 : vector<1x8x256xf32> to vector<8x256xf32>
      %13 = vector.shape_cast %9 : vector<8x256xf32> to vector<1x8x256xf32>
      tpu.vector_store %arg4[%10, %c0_5, %c0_6], %13 {strides = array<i32>} : memref<1x8x256xf32, #tpu.memory_space<vmem>>, vector<1x8x256xf32>,
      %14 = vector.shape_cast %9 : vector<8x256xf32> to vector<1x8x256xf32>
      %cst = arith.constant dense<0.000000e+00> : vector<1xf32>
      %15 = vector.multi_reduction <add>, %14, %cst [1, 2] : vector<1x8x256xf32> to vector<1xf32>
      %16 = vector.shape_cast %15 : vector<1xf32> to vector<1x1x1xf32>
      %17 = vector.extract %16[0, 0, 0] : f32 from vector<1x1x1xf32>
      %cst_7 = arith.constant 2.048000e+03 : f32
      %18 = arith.divf %17, %cst_7 : f32
      %19 = vector.broadcast %18 : f32 to vector<8x256xf32>
      %20 = arith.subf %9, %19 : vector<8x256xf32>
      %21 = arith.mulf %20, %20 : vector<8x256xf32>
      %22 = vector.shape_cast %21 : vector<8x256xf32> to vector<1x8x256xf32>
      %cst_8 = arith.constant dense<0.000000e+00> : vector<1xf32>
      %23 = vector.multi_reduction <add>, %22, %cst_8 [1, 2] : vector<1x8x256xf32> to vector<1xf32>
      %24 = vector.shape_cast %23 : vector<1xf32> to vector<1x1x1xf32>
      %25 = vector.extract %24[0, 0, 0] : f32 from vector<1x1x1xf32>
      %cst_9 = arith.constant 2.048000e+03 : f32
      %26 = arith.divf %17, %cst_9 : f32
      %c0_10 = arith.constant 0 : index
      %c0_11 = arith.constant 0 : index
      %27 = vector.load %arg5[%c0_10, %c0_11] : memref<1x1xf32, #tpu.memory_space<vmem>>, vector<1x1xf32>
      %c0_12 = arith.constant 0 : index
      %c0_13 = arith.constant 0 : index
      %28 = vector.load %arg6[%c0_12, %c0_13] : memref<1x1xf32, #tpu.memory_space<vmem>>, vector<1x1xf32>
      %cst_14 = arith.constant 2.048000e+03 : f32
      %29 = vector.broadcast %cst_14 : f32 to vector<1x1xf32>
      %30 = arith.addf %27, %29 : vector<1x1xf32>
      %31 = vector.broadcast %26 : f32 to vector<1x1xf32>
      %32 = arith.subf %31, %28 : vector<1x1xf32>
      %c0_15 = arith.constant 0 : index
      %c0_16 = arith.constant 0 : index
      %33 = vector.load %arg5[%c0_15, %c0_16] : memref<1x1xf32, #tpu.memory_space<vmem>>, vector<1x1xf32>
      tpu.vector_store %arg5[%c0_15, %c0_16], %30 {strides = array<i32>} : memref<1x1xf32, #tpu.memory_space<vmem>>, vector<1x1xf32>,
      %cst_17 = arith.constant 2.048000e+03 : f32
      %34 = vector.broadcast %cst_17 : f32 to vector<1x1xf32>
      %35 = arith.divf %34, %30 : vector<1x1xf32>
      %36 = arith.mulf %32, %35 : vector<1x1xf32>
      %37 = arith.addf %28, %36 : vector<1x1xf32>
      %c0_18 = arith.constant 0 : index
      %c0_19 = arith.constant 0 : index
      %38 = vector.load %arg6[%c0_18, %c0_19] : memref<1x1xf32, #tpu.memory_space<vmem>>, vector<1x1xf32>
      tpu.vector_store %arg6[%c0_18, %c0_19], %37 {strides = array<i32>} : memref<1x1xf32, #tpu.memory_space<vmem>>, vector<1x1xf32>,
      %c0_20 = arith.constant 0 : index
      %c0_21 = arith.constant 0 : index
      %39 = vector.load %arg7[%c0_20, %c0_21] : memref<1x1xf32, #tpu.memory_space<vmem>>, vector<1x1xf32>
      %40 = vector.broadcast %25 : f32 to vector<1x1xf32>
      %41 = arith.addf %39, %40 : vector<1x1xf32>
      %42 = arith.mulf %32, %32 : vector<1x1xf32>
      %cst_22 = arith.constant 2.048000e+03 : f32
      %43 = vector.broadcast %cst_22 : f32 to vector<1x1xf32>
      %44 = arith.divf %43, %30 : vector<1x1xf32>
      %45 = arith.mulf %27, %44 : vector<1x1xf32>
      %46 = arith.mulf %42, %45 : vector<1x1xf32>
      %47 = arith.addf %41, %46 : vector<1x1xf32>
      %c0_23 = arith.constant 0 : index
      %c0_24 = arith.constant 0 : index
      %48 = vector.load %arg7[%c0_23, %c0_24] : memref<1x1xf32, #tpu.memory_space<vmem>>, vector<1x1xf32>
      tpu.vector_store %arg7[%c0_23, %c0_24], %47 {strides = array<i32>} : memref<1x1xf32, #tpu.memory_space<vmem>>, vector<1x1xf32>,
    } else {
    }
    %c1_i32 = arith.constant 1 : i32
    %3 = arith.cmpi eq, %arg0, %c1_i32 : i32
    %4 = arith.extui %3 : i1 to i32
    %c0_i32_1 = arith.constant 0 : i32
    %5 = arith.cmpi ne, %4, %c0_i32_1 : i32
    scf.if %5 {
      %c0_i32_2 = arith.constant 0 : i32
      %6 = arith.cmpi eq, %arg1, %c0_i32_2 : i32
      %7 = arith.extui %6 : i1 to i32
      %c0_i32_3 = arith.constant 0 : i32
      %8 = arith.cmpi ne, %7, %c0_i32_3 : i32
      scf.if %8 {
        %c0_11 = arith.constant 0 : index
        %c0_12 = arith.constant 0 : index
        %19 = vector.load %arg7[%c0_11, %c0_12] : memref<1x1xf32, #tpu.memory_space<vmem>>, vector<1x1xf32>
        %c0_13 = arith.constant 0 : index
        %c0_14 = arith.constant 0 : index
        %20 = vector.load %arg5[%c0_13, %c0_14] : memref<1x1xf32, #tpu.memory_space<vmem>>, vector<1x1xf32>
        %cst = arith.constant 1.000000e+00 : f32
        %21 = vector.broadcast %cst : f32 to vector<1x1xf32>
        %22 = arith.subf %20, %21 : vector<1x1xf32>
        %23 = arith.divf %19, %22 : vector<1x1xf32>
        %24 = math.sqrt %23 : vector<1x1xf32>
        %cst_15 = arith.constant 9.99999974E-6 : f32
        %25 = vector.broadcast %cst_15 : f32 to vector<1x1xf32>
        %26 = arith.addf %24, %25 : vector<1x1xf32>
        %cst_16 = arith.constant 1.000000e+00 : f32
        %27 = vector.broadcast %cst_16 : f32 to vector<1x1xf32>
        %28 = arith.divf %27, %26 : vector<1x1xf32>
        %c0_17 = arith.constant 0 : index
        %c0_18 = arith.constant 0 : index
        %29 = vector.load %arg8[%c0_17, %c0_18] : memref<1x1xf32, #tpu.memory_space<vmem>>, vector<1x1xf32>
        tpu.vector_store %arg8[%c0_17, %c0_18], %28 {strides = array<i32>} : memref<1x1xf32, #tpu.memory_space<vmem>>, vector<1x1xf32>,
      } else {
      }
      %9 = arith.index_cast %arg1 : i32 to index
      %c0 = arith.constant 0 : index
      %c0_4 = arith.constant 0 : index
      %10 = vector.load %arg4[%9, %c0, %c0_4] : memref<1x8x256xf32, #tpu.memory_space<vmem>>, vector<1x8x256xf32>
      %11 = vector.shape_cast %10 : vector<1x8x256xf32> to vector<8x256xf32>
      %c0_5 = arith.constant 0 : index
      %c0_6 = arith.constant 0 : index
      %12 = vector.load %arg6[%c0_5, %c0_6] : memref<1x1xf32, #tpu.memory_space<vmem>>, vector<1x1xf32>
      %13 = vector.broadcast %12 : vector<1x1xf32> to vector<8x256xf32>
      %14 = arith.subf %11, %13 : vector<8x256xf32>
      %c0_7 = arith.constant 0 : index
      %c0_8 = arith.constant 0 : index
      %15 = vector.load %arg8[%c0_7, %c0_8] : memref<1x1xf32, #tpu.memory_space<vmem>>, vector<1x1xf32>
      %16 = vector.broadcast %15 : vector<1x1xf32> to vector<8x256xf32>
      %17 = arith.mulf %14, %16 : vector<8x256xf32>
      %c0_9 = arith.constant 0 : index
      %c0_10 = arith.constant 0 : index
      %18 = vector.load %arg3[%c0_9, %c0_10] : memref<8x256xf32, #tpu.memory_space<vmem>>, vector<8x256xf32>
      tpu.vector_store %arg3[%c0_9, %c0_10], %17 {strides = array<i32>} : memref<8x256xf32, #tpu.memory_space<vmem>>, vector<8x256xf32>,
    } else {
    }
    return
  }
  func.func @transform_0(%arg0: i32, %arg1: i32) -> (i32, i32) {
    %c1_i32 = arith.constant 1 : i32
    %0 = arith.subi %c1_i32, %arg0 : i32
    %1 = arith.muli %0, %arg1 : i32
    %c0_i32 = arith.constant 0 : i32
    %2 = arith.muli %arg0, %c0_i32 : i32
    %3 = arith.addi %1, %2 : i32
    %c0_i32_0 = arith.constant 0 : i32
    %c0_i32_1 = arith.constant 0 : i32
    return %3, %c0_i32_0 : i32, i32
  }
  func.func @transform_1(%arg0: i32, %arg1: i32) -> (i32, i32) {
    %0 = arith.muli %arg0, %arg1 : i32
    %c0_i32 = arith.constant 0 : i32
    %c0_i32_0 = arith.constant 0 : i32
    return %0, %c0_i32 : i32, i32
  }
}

</mosaic_0001>

<bundles_post_ra>
// kernel: tpu_custom_call.1
= control target key start
LH: loop header
LB: loop body
LE: loop exit
PB: predicated region body
PF: predicated region fallthrough
CT: control target
= control target key end

     0   :  { %6 = vsyncpa [#allocation8], 0  ;;  %s669_s0 = inlined_call_operand.hbm [shape: f32[8,256], index: 0, kind: input, shape index: {}]   ;;  %s670_s1 = inlined_call_operand.hbm [shape: f32[8,256], index: 1, kind: output, shape index: {}]  }
   0x1   :  { %8 = vsyncpa [#allocation8 + $0x1], 0 }
   0x2   :  { %9 = vsyncpa [#allocation9], 0 }
   0x3   :  { %11 = vsyncpa [#allocation9 + $0x1], 0  ;;  %s613_s6 = smov 0   ;;  %s615_s7 = smov 0  }
   0x4   :  { %s617_s8 = smov 0  }
   0x5 LB: > { %s424_s9 = sadd.s32 4294967295, %s596_s8   ;;  %s425_s10 = sadd.s32 4294967294, %s596_s8   ;;  %s596_s8 = sphi %s617_s8, %s17_s8   ;;  %s592_s7 = sphi %s615_s7, %s672_s7   ;;  %s588_s6 = sphi %s613_s6, %s671_s6  }
   0x6   : > { %s29_s11 = sadd.s32 1, %s592_s7  ;;  %p427_p0 = scmp.ge.s32.totalorder %s596_s8, 2 }
   0x7   : > { %p31_p1 = scmp.ge.s32.totalorder %s29_s11, 2  ;;  %p460_p2 = scmp.lt.s32.totalorder %s596_s8, 2 }
   0x8   : > { %p461_p3 = scmp.eq.s32.totalorder %s596_s8, 0  ;;  %s118_s14 = sshll.u32 %s669_s0, 4  ;;  %s119_s14 = int_to_ptr.hbm [resolvable:$true] %s118_s14 }
   0x9   : > { %s674_s11 = smov (%p31_p1, %s29_s11), 0  ;;  %s598_s15 = smov [#allocation7]  }
   0xa   : > { %s120_s16 = sshll.u32 %s598_s15, 4  ;;  %p453_p4 = pnand %p461_p3, %p460_p2  ;;  %s121_s16 = int_to_ptr.vmem [resolvable:$true] %s120_s16 }
   0xb   : > { %p429_p5 = scmp.ge.s32.totalorder %s596_s8, 1  ;;  %p125_p6 = scmp.lt.s32.totalorder %s596_s8, 3 }
   0xc   : > { %455 = dma.hbm_to_vmem [thread:$0]  (!%p453_p4), %s119_s14, 256, %s121_s16, [#allocation8]  }
   0xd   : > { %p126_p7 = pnand %p429_p5, %p125_p6 }
   0xe   : > { %p462_p8 = scmp.eq.s32.totalorder (!%p126_p7), %s424_s9, 0 }
   0xf   : > { %129 = sbr.rel (%p126_p7) target bundleno = 603 (0x25b), region = 24 }
  0x14   : > { %579 = dma.done.wait (%p462_p8), [#allocation8], 256  }
  0x15   : > { %581 = vsyncadd (%p462_p8), [#allocation8], 4294967040  ;;  %p431_p9 = scmp.ne.s32.totalorder %s588_s6, 0 }
  0x17   : > { %161 = sbr.rel (%p431_p9) target bundleno = 403 (0x193), region = 32 }
  0x1c   : > { %v170_v0 = vld [vmem:[#allocation7] sm:$0xff]  ;;  %v171_v1 = vld [vmem:[#allocation7 + $0x8] sm:$0xff]  ;;  %v599_v3 = vmov 2048.0   ;;  %vm166_vm0 = vcmask 0   ;;  %v600_v14 = vmov 0.0  }
  0x1d   : > { %176 = vst [vmem:[#allocation2 + $0x8] sm:$0xff] %v171_v1  ;;  %v177_v2 = vadd.f32 %v171_v1, %v170_v0  ;;  %495 = vrcp.f32 %v599_v3 }
  0x1e   : > { %175 = vst [vmem:[#allocation2] sm:$0xff] %v170_v0 }
  0x1f   : > { %178 = vadd.xlane.f32.xlu0 %v177_v2  ;;  %167 = vst.msk [vmem:[#allocation3] sm:$0x1] %vm166_vm0, %v600_v14 }
  0x20   : > { %168 = vst.msk [vmem:[#allocation4] sm:$0x1] %vm166_vm0, %v600_v14 }
  0x21   : > { %169 = vst.msk [vmem:[#allocation5] sm:$0x1] %vm166_vm0, %v600_v14 }
  0x23   : > { %v496_v4 = vpop.eup %495 }
  0x24   : > { %v188_v5 = vmul.f32 2048.0, %v496_v4  ;;  %vm192_vm1 = vweird.f32 %v496_v4 }
  0x26   : > { %v189_v6 = vsub.f32 1.0, %v188_v5  ;;  %v211_v18 = vld [vmem:[#allocation3] sm:$0x1] }
  0x27   : > { %v213_v19 = vadd.f32 2048.0, %v211_v18  ;;  %v212_v32 = vld [vmem:[#allocation4] sm:$0x1] }
  0x28   : > { %v190_v10 = vmul.f32 %v496_v4, %v189_v6  ;;  %v235_v51 = vld [vmem:[#allocation5] sm:$0x1] }
  0x29   : > { %216 = vst.msk [vmem:[#allocation3] sm:$0x1] %vm166_vm0, %v213_v19  ;;  %497 = vrcp.f32 %v213_v19  ;;  %v228_v24 = vand.u32 2147483648, %v213_v19  ;;  %vm222_vm2 = vweird.f32 %v213_v19  ;;  %v226_v26 = vand.u32 2147483647, %v213_v19 }
  0x2a   : > { %v191_v13 = vadd.f32 %v496_v4, %v190_v10 }
  0x2b   : > { %v229_v27 = vor.u32 1.1754944e-38, %v228_v24  ;;  %vm227_vm5 = vcmp.eq.f32.partialorder %v226_v26, 8.507059e+37 }
  0x2c   : > { %v193_v17 = vsel %vm192_vm1, %v496_v4, %v191_v13 }
  0x2f   : > { %v498_v20 = vpop.eup %497 }
  0x30   : > { %v218_v21 = vmul.f32 %v498_v20, %v213_v19  ;;  %vm223_vm3 = vweird.f32 %v498_v20 }
  0x31   : > { %vm224_vm4 = vmor %vm222_vm2, %vm223_vm3 }
  0x32   : > { %v219_v22 = vsub.f32 1.0, %v218_v21 }
  0x34   : > { %v220_v23 = vmul.f32 %v498_v20, %v219_v22 }
  0x36   : > { %v221_v25 = vadd.f32 %v498_v20, %v220_v23 }
  0x38   : > { %v225_v28 = vsel %vm224_vm4, %v498_v20, %v221_v25 }
  0x39   : > { %v230_v29 = vsel %vm227_vm5, %v229_v27, %v225_v28 }
  0x3a   : > { %v231_v30 = vmul.f32 2048.0, %v230_v29 }
  0x3c   : > { %v239_v31 = vmul.f32 %v231_v30, %v211_v18 }
  0x92   : > { %v179_v7 = vpop.xlane.xlu0 %178 }
  0x93   : > { %v180_v8 = vrot.slane %v179_v7, 4 }
  0x95   : > { %v181_v9 = vadd.f32 %v180_v8, %v179_v7 }
  0x97   : > { %v182_v11 = vrot.slane %v181_v9, 2 }
  0x99   : > { %v183_v12 = vadd.f32 %v182_v11, %v181_v9 }
  0x9b   : > { %v184_v15 = vrot.slane %v183_v12, 1 }
  0x9d   : > { %v185_v16 = vadd.f32 %v184_v15, %v183_v12 }
  0x9f   : > { %438 = vpush %v185_v16 }
  0xa0   : > { %440 = vpush %v193_v17 }
  0xd0   : > { %s439_s17 = spop %438 }
  0xd1   : > { %s441_s18 = spop %440 }
  0xd2   : > { %s195_s19 = smul.f32 %s441_s18, %s439_s17 }
  0xd4   : > { %v196_v33 = vstv %s195_s19 }
  0xd5   : > { %v197_v34 = vsub.f32 %v170_v0, %v196_v33  ;;  %v198_v35 = vsub.f32 %v171_v1, %v196_v33  ;;  %v214_v36 = vsub.f32 %v196_v33, %v212_v32 }
  0xd7   : > { %v232_v37 = vmul.f32 %v231_v30, %v214_v36  ;;  %v238_v38 = vmul.f32 %v214_v36, %v214_v36  ;;  %v199_v39 = vmul.f32 %v197_v34, %v197_v34  ;;  %v200_v40 = vmul.f32 %v198_v35, %v198_v35 }
  0xd9   : > { %v233_v41 = vadd.f32 %v232_v37, %v212_v32  ;;  %v201_v42 = vadd.f32 %v200_v40, %v199_v39  ;;  %v240_v43 = vmul.f32 %v239_v31, %v238_v38 }
  0xdb   : > { %234 = vst.msk [vmem:[#allocation4] sm:$0x1] %vm166_vm0, %v233_v41  ;;  %202 = vadd.xlane.f32.xlu0 %v201_v42 }
 0x14e   : > { %v203_v44 = vpop.xlane.xlu0 %202 }
 0x14f   : > { %v204_v45 = vrot.slane %v203_v44, 4 }
 0x151   : > { %v205_v46 = vadd.f32 %v204_v45, %v203_v44 }
 0x153   : > { %v206_v47 = vrot.slane %v205_v46, 2 }
 0x155   : > { %v207_v48 = vadd.f32 %v206_v47, %v205_v46 }
 0x157   : > { %v208_v49 = vrot.slane %v207_v48, 1 }
 0x159   : > { %v209_v50 = vadd.f32 %v208_v49, %v207_v48 }
 0x15b   : > { %442 = vpush %v209_v50 }
 0x18c   : > { %s443_s20 = spop %442 }
 0x18d   : > { %v236_v52 = vstv %s443_s20 }
 0x18e   : > { %v237_v53 = vadd.f32 %v236_v52, %v235_v51 }
 0x190   : > { %v241_v54 = vadd.f32 %v240_v43, %v237_v53 }
 0x192   : > { %242 = vst.msk [vmem:[#allocation5] sm:$0x1] %vm166_vm0, %v241_v54 }
 0x193 PF: > { %p432_p10 = scmp.ne.s32.totalorder %s588_s6, 1 }
 0x195   : > { %246 = sbr.rel (%p432_p10) target bundleno = 599 (0x257), region = 40 }
 0x19a   : > { %v500_v55 = vld [vmem:[#allocation4] ss:$0 sm:$0xff]  ;;  %v601_v56 = vmov 0   ;;  %v252_v57 = vld [vmem:[#allocation3] sm:$0x1]  ;;  %vm297_vm0 = vcmask 0  }
 0x19b   : > { %499 = vset.pattern.permute.xlu0 %v601_v56  ;;  %v433_v58 = vadd.f32 -1.0, %v252_v57  ;;  %v251_v3 = vld [vmem:[#allocation5] sm:$0x1]  ;;  %v302_v30 = vld [vmem:[#allocation2] sm:$0xff]  ;;  %v303_v31 = vld [vmem:[#allocation2 + $0x8] sm:$0xff] }
 0x19c   : > { %308 = vperm.xlu0 %499, %v500_v55  }
 0x19d   : > { %502 = vrcp.f32 %v433_v58  ;;  %v265_v61 = vand.u32 2147483648, %v433_v58  ;;  %vm259_vm6 = vweird.f32 %v433_v58  ;;  %v263_v63 = vand.u32 2147483647, %v433_v58 }
 0x19f   : > { %v266_v1 = vor.u32 1.1754944e-38, %v265_v61  ;;  %vm264_vm9 = vcmp.eq.f32.partialorder %v263_v63, 8.507059e+37 }
 0x1a3   : > { %v503_v59 = vpop.eup %502 }
 0x1a4   : > { %v255_v60 = vmul.f32 %v503_v59, %v433_v58  ;;  %vm260_vm7 = vweird.f32 %v503_v59 }
 0x1a5   : > { %vm261_vm8 = vmor %vm259_vm6, %vm260_vm7 }
 0x1a6   : > { %v256_v62 = vsub.f32 1.0, %v255_v60 }
 0x1a8   : > { %v257_v0 = vmul.f32 %v503_v59, %v256_v62 }
 0x1aa   : > { %v258_v2 = vadd.f32 %v503_v59, %v257_v0 }
 0x1ac   : > { %v262_v4 = vsel %vm261_vm8, %v503_v59, %v258_v2 }
 0x1ad   : > { %v267_v5 = vsel %vm264_vm9, %v266_v1, %v262_v4 }
 0x1ae   : > { %v268_v6 = vmul.f32 %v267_v5, %v251_v3 }
 0x1b0   : > { %504 = vrsqrt.f32 %v268_v6  ;;  %vm276_vm10 = vcmp.eq.f32.partialorder %v268_v6, inf  ;;  %v279_v13 = vand.u32 2147483648, %v268_v6  ;;  %vm278_vm11 = vcmp.eq.f32.partialorder %v268_v6, 0.0 }
 0x1b6   : > { %v505_v7 = vpop.eup %504 }
 0x1b7   : > { %v270_v8 = vmul.f32 %v505_v7, %v268_v6 }
 0x1b9   : > { %v271_v9 = vmul.f32 %v505_v7, %v270_v8 }
 0x1bb   : > { %v272_v10 = vmul.f32 0.5, %v271_v9 }
 0x1bd   : > { %v273_v11 = vsub.f32 1.5, %v272_v10 }
 0x1bf   : > { %v274_v12 = vmul.f32 %v505_v7, %v273_v11 }
 0x1c1   : > { %v275_v14 = vmul.f32 %v274_v12, %v268_v6 }
 0x1c3   : > { %v277_v15 = vsel %vm276_vm10, %v268_v6, %v275_v14 }
 0x1c4   : > { %v280_v16 = vsel %vm278_vm11, %v279_v13, %v277_v15 }
 0x1c5   : > { %v281_v17 = vadd.f32 1e-05, %v280_v16 }
 0x1c7   : > { %506 = vrcp.f32 %v281_v17  ;;  %v293_v20 = vand.u32 2147483648, %v281_v17  ;;  %vm287_vm12 = vweird.f32 %v281_v17  ;;  %v291_v22 = vand.u32 2147483647, %v281_v17 }
 0x1c9   : > { %v294_v24 = vor.u32 1.1754944e-38, %v293_v20  ;;  %vm292_vm15 = vcmp.eq.f32.partialorder %v291_v22, 8.507059e+37 }
 0x1cd   : > { %v507_v18 = vpop.eup %506 }
 0x1ce   : > { %v283_v19 = vmul.f32 %v507_v18, %v281_v17  ;;  %vm288_vm13 = vweird.f32 %v507_v18 }
 0x1cf   : > { %vm289_vm14 = vmor %vm287_vm12, %vm288_vm13 }
 0x1d0   : > { %v284_v21 = vsub.f32 1.0, %v283_v19 }
 0x1d2   : > { %v285_v23 = vmul.f32 %v507_v18, %v284_v21 }
 0x1d4   : > { %v286_v25 = vadd.f32 %v507_v18, %v285_v23 }
 0x1d6   : > { %v290_v26 = vsel %vm289_vm14, %v507_v18, %v286_v25 }
 0x1d7   : > { %v295_v27 = vsel %vm292_vm15, %v294_v24, %v290_v26 }
 0x1d8   : > { %298 = vst.msk [vmem:[#allocation6] sm:$0x1] %vm297_vm0, %v295_v27 }
 0x1df   : > { %v501_v28 = vld [vmem:[#allocation6] ss:$0 sm:$0xff] }
 0x1e0   : > { %317 = vperm.xlu0 %499, %v501_v28  }
 0x20e   : > { %v309_v29 = vpop.permute.xlu0 %308 }
 0x20f   : > { %v311_v32 = vsub.f32 %v302_v30, %v309_v29  ;;  %v312_v33 = vsub.f32 %v303_v31, %v309_v29 }
 0x252   : > { %v318_v34 = vpop.permute.xlu0 %317 }
 0x253   : > { %v320_v35 = vmul.f32 %v318_v34, %v311_v32  ;;  %v321_v36 = vmul.f32 %v318_v34, %v312_v33 }
 0x255   : > { %322 = vst [vmem:[#allocation10] sm:$0xff] %v320_v35 }
 0x256   : > { %323 = vst [vmem:[#allocation10 + $0x8] sm:$0xff] %v321_v36 }
 0x257 PF: > { %p463_p11 = scmp.eq.s32.totalorder %s424_s9, 1  ;;  %s341_s23 = sshll.u32 %s670_s1, 4  ;;  %s342_s23 = int_to_ptr.hbm [resolvable:$true] %s341_s23 }
 0x258   : > { %s602_s24 = smov [#allocation10]  }
 0x259   : > { %s339_s25 = sshll.u32 %s602_s24, 4  ;;  %s340_s25 = int_to_ptr.vmem [resolvable:$true] %s339_s25 }
 0x25a   : > { %449 = dma.vmem_to_hbm [thread:$0]  (%p463_p11), %s340_s25, 256, %s342_s23, [#allocation9]  }
 0x25b PF: > { %p465_p12 = scmp.eq.s32.totalorder %s425_s10, 1 }
 0x25d   : > { %p457_p13 = pnand %p465_p12, %p427_p0 }
 0x25f   : > { %p458_p1 = pneg %p457_p13 }
 0x261   : > { %583 = dma.done.wait (%p458_p1), [#allocation9], 256  }
 0x262   : > { %585 = vsyncadd (%p458_p1), [#allocation9], 4294967040  ;;  %s17_s8 = sadd.s32 1, %s596_s8   ;;  %s671_s6 = smov %s592_s7 }
 0x263   : > { %p14_p2 = scmp.ge.s32.totalorder %s17_s8, 4   ;;  %s672_s7 = smov %s674_s11 }
 0x265   :  { %16 = sbr.rel (!%p14_p2) target bundleno = 5 (0x5), region = 87 }
 0x26a   :  { %360 = vsyncpa [#allocation8], 1 }
 0x26b   :  { %362 = vsyncpa [#allocation8 + $0x1], 1 }
 0x26c   :  { %363 = vsyncpa [#allocation9], 1 }
 0x26d   :  { %365 = vsyncpa [#allocation9 + $0x1], 1 }

</bundles_post_ra>
